<compile_context>
chip_gen: v7x
topology: tpu7x:2x2x1
jax: 0.10.0
libtpu: 0.0.40
codegen_flags: <defaults>
</compile_context>

<pallas_src>
import jax
import jax.numpy as jnp
from jax.experimental import pallas as pl
from jax.experimental.pallas import tpu as pltpu


def _round_up(x, n):
    return ((x + n - 1) // n) * n


def _aggregation_kernel(x_ref, wt_ref, b_ref, o_ref):
    # Linear: y = x_packed @ W_packed^T + b_packed   (operands already in VMEM)
    y = jnp.dot(x_ref[...], wt_ref[...], preferred_element_type=jnp.float32)
    y = y + b_ref[...]                                  # (tm, n_p) + (1, n_p), f32
    # LeakyReLU (negative_slope = 0.01); stay in f32, cast only at the store.
    o_ref[...] = jnp.where(y > 0, y, 0.01 * y).astype(o_ref.dtype)


def prepare_aggregation_params(weight, bias):
    """One-time parameter prep (hoisted out of the per-call path).

    weight: (output_dim, input_dim), bias: (output_dim,).

    If input_dim divides 128, build a `pack`-way block-diagonal W^T so that
    `pack` consecutive rows of x are processed as one 128-lane packed row:
        wt: (pack*input_dim, pack*output_dim),  b: (1, pack*output_dim).
    Otherwise fall back to zero-padding the output axis to a multiple of 128
    (lane-dense stores; padded columns are sliced off in the wrapper).
    """
    out_dim, in_dim = weight.shape
    wt = weight.T.astype(jnp.float32)                   # (in_dim, out_dim)
    b = bias.astype(jnp.float32)                        # (out_dim,)

    if in_dim <= 128 and 128 % in_dim == 0:
        pack = 128 // in_dim
        k_p, n_p = pack * in_dim, pack * out_dim
        wt_big = jnp.zeros((k_p, n_p), jnp.float32)
        for p in range(pack):
            wt_big = wt_big.at[p * in_dim:(p + 1) * in_dim,
                               p * out_dim:(p + 1) * out_dim].set(wt)
        b_big = jnp.tile(b[None, :], (1, pack))         # (1, pack*out_dim)
        return {"mode": "packed", "pack": pack, "wt": wt_big, "b": b_big,
                "in_dim": in_dim, "out_dim": out_dim}

    # Generic fallback: lane-pad the output axis to a multiple of 128.
    n_p = _round_up(out_dim, 128)
    wt_pad = jnp.zeros((in_dim, n_p), jnp.float32).at[:, :out_dim].set(wt)
    b_pad = jnp.zeros((1, n_p), jnp.float32).at[:, :out_dim].set(b)
    return {"mode": "padded", "pack": 1, "wt": wt_pad, "b": b_pad,
            "in_dim": in_dim, "out_dim": out_dim}


def aggregation_forward(x, params, *, tm=1024):
    """x: (..., input_dim) -> (..., output_dim)."""
    in_dim = params["in_dim"]
    out_dim = params["out_dim"]
    pack = params["pack"]
    wt = params["wt"]
    b = params["b"]
    k_p, n_p = wt.shape

    lead_shape = x.shape[:-1]
    x2d = x.reshape(-1, in_dim)
    m = x2d.shape[0]

    # Row packing needs m % pack == 0; only the (rare) remainder case pays a
    # pad + slice pass.  In the common case there is no wrapper pad/slice.
    pad_rows = (-m) % pack
    if pad_rows:
        x2d = jnp.pad(x2d, ((0, pad_rows), (0, 0)))
    m_pad = m + pad_rows
    m_rows = m_pad // pack
    x_packed = x2d.reshape(m_rows, k_p)                 # free, contiguous reshape

    # ---- choose the M tile ---------------------------------------------------
    if m_rows <= 8:
        tm = max(1, m_rows)          # one full block (block dim == full array dim)
    else:
        if m_rows >= 64:
            # >=4 grid steps: keeps both v7x TensorCores busy and gives the
            # pipeliner something to overlap.
            tm = min(tm, _round_up(pl.cdiv(m_rows, 4), 8))
        elif m_rows >= 16:
            tm = min(tm, _round_up(pl.cdiv(m_rows, 2), 8))
        tm = max(8, min(tm, _round_up(m_rows, 8)))

        # VMEM budget guard: x + out double-buffered, weight (x2) + bias resident.
        def _vmem_bytes(t):
            return 4 * (2 * t * k_p + 2 * t * n_p + 2 * k_p * n_p + 2 * n_p)

        while tm > 8 and _vmem_bytes(tm) > 24 * 1024 * 1024:
            tm = max(8, _round_up(tm // 2, 8))

    grid = (pl.cdiv(m_rows, tm),)

    # Honest scheduler hint (actual kernel work / traffic).
    flops = 2 * m_rows * k_p * n_p
    bytes_accessed = (
        m_rows * k_p * x_packed.dtype.itemsize
        + k_p * n_p * wt.dtype.itemsize
        + n_p * b.dtype.itemsize
        + m_rows * n_p * x.dtype.itemsize
    )

    out = pl.pallas_call(
        _aggregation_kernel,
        out_shape=jax.ShapeDtypeStruct((m_rows, n_p), x.dtype),
        grid_spec=pl.GridSpec(
            grid=grid,
            in_specs=[
                pl.BlockSpec((tm, k_p), lambda i: (i, 0)),    # x: tiled on M
                pl.BlockSpec((k_p, n_p), lambda i: (0, 0)),   # W^T: resident
                pl.BlockSpec((1, n_p), lambda i: (0, 0)),     # bias: resident
            ],
            out_specs=pl.BlockSpec((tm, n_p), lambda i: (i, 0)),
        ),
        compiler_params=pltpu.CompilerParams(
            dimension_semantics=("parallel",),
        ),
        cost_estimate=pl.CostEstimate(
            flops=flops, transcendentals=0, bytes_accessed=bytes_accessed
        ),
    )(x_packed, wt, b)

    if params["mode"] == "packed":
        out2d = out.reshape(m_pad, out_dim)                 # free, contiguous reshape
    else:
        out2d = out[:, :out_dim]                            # fallback path only
    if pad_rows:
        out2d = out2d[:m]
    return out2d.reshape(*lead_shape, out_dim)


if __name__ == "__main__":
    # Small shapes consistent with the module: batch=8, input_dim=32, output_dim=64
    input_dim, output_dim = 32, 64
    batch = 8

    key = jax.random.PRNGKey(0)
    kx, kw, kb = jax.random.split(key, 3)

    # Deterministic synthetic parameters (mimics nn.Linear init ranges/shapes).
    bound = 1.0 / jnp.sqrt(jnp.float32(input_dim))
    weight = jax.random.uniform(kw, (output_dim, input_dim), jnp.float32, -bound, bound)
    bias = jax.random.uniform(kb, (output_dim,), jnp.float32, -bound, bound)

    x = jax.random.normal(kx, (batch, input_dim), jnp.float32)

    # One-time prep (transpose + row-pack), then the forward call.
    params = prepare_aggregation_params(weight, bias)
    out = aggregation_forward(x, params)
    out = jax.block_until_ready(out)

    # Reference in plain JAX (high-precision matmul to bound the check).
    ref = jnp.dot(x, weight.T, precision=jax.lax.Precision.HIGHEST) + bias
    ref = jnp.where(ref > 0, ref, 0.01 * ref)

    assert out.shape == (batch, output_dim)
    # Tolerance covers possible bf16-pass matmul defaults on TPU.
    assert jnp.allclose(out, ref, atol=2e-2, rtol=2e-2)

    print("KERNEL_OK")
</pallas_src>

<mosaic_0001>
module attributes {stable_mosaic.version = 11 : i64} {
  func.func @_aggregation_kernel(%arg0: i32, %arg1: memref<2x128xf32, #tpu.memory_space<vmem>>, %arg2: memref<128x256xf32, #tpu.memory_space<vmem>>, %arg3: memref<1x256xf32, #tpu.memory_space<vmem>>, %arg4: memref<2x256xf32, #tpu.memory_space<vmem>>) attributes {dimension_semantics = [#tpu.dimension_semantics<parallel>], iteration_bounds = array<i64: 1>, scalar_prefetch = 0 : i64, scratch_operands = 0 : i64, tpu.core_type = #tpu.core_type<tc>, window_params = [{transform_indices = @transform_0, window_bounds = array<i64: 2, 128>}, {pipeline_mode = #tpu.pipeline_mode<synchronous>, transform_indices = @transform_1, window_bounds = array<i64: 128, 256>}, {pipeline_mode = #tpu.pipeline_mode<synchronous>, transform_indices = @transform_2, window_bounds = array<i64: 1, 256>}, {transform_indices = @transform_3, window_bounds = array<i64: 2, 256>}]} {
    %c0 = arith.constant 0 : index
    %c0_0 = arith.constant 0 : index
    %0 = vector.load %arg1[%c0, %c0_0] : memref<2x128xf32, #tpu.memory_space<vmem>>, vector<2x128xf32>
    %c0_1 = arith.constant 0 : index
    %c0_2 = arith.constant 0 : index
    %1 = vector.load %arg2[%c0_1, %c0_2] : memref<128x256xf32, #tpu.memory_space<vmem>>, vector<128x256xf32>
    %cst = arith.constant dense<0.000000e+00> : vector<2x256xf32>
    %2 = tpu.matmul %0, %1, %cst {dimension_numbers = #tpu.dot_dimension_numbers<[1], [0], [0], [1], [0, 0, 1, 1], [], []>} : vector<2x128xf32>, vector<128x256xf32>, vector<2x256xf32> -> vector<2x256xf32>
    %c0_3 = arith.constant 0 : index
    %c0_4 = arith.constant 0 : index
    %3 = vector.load %arg3[%c0_3, %c0_4] : memref<1x256xf32, #tpu.memory_space<vmem>>, vector<1x256xf32>
    %4 = vector.broadcast %3 : vector<1x256xf32> to vector<2x256xf32>
    %5 = arith.addf %2, %4 : vector<2x256xf32>
    %cst_5 = arith.constant 0.000000e+00 : f32
    %6 = vector.broadcast %cst_5 : f32 to vector<2x256xf32>
    %7 = arith.cmpf ogt, %5, %6 : vector<2x256xf32>
    %cst_6 = arith.constant 0.00999999977 : f32
    %8 = vector.broadcast %cst_6 : f32 to vector<2x256xf32>
    %9 = arith.mulf %8, %5 : vector<2x256xf32>
    %10 = arith.select %7, %5, %9 : vector<2x256xi1>, vector<2x256xf32>
    %c0_7 = arith.constant 0 : index
    %c0_8 = arith.constant 0 : index
    %11 = vector.load %arg4[%c0_7, %c0_8] : memref<2x256xf32, #tpu.memory_space<vmem>>, vector<2x256xf32>
    tpu.vector_store %arg4[%c0_7, %c0_8], %10 {strides = array<i32>} : memref<2x256xf32, #tpu.memory_space<vmem>>, vector<2x256xf32>,
    return
  }
  func.func @transform_0(%arg0: i32) -> (i32, i32) {
    %c0_i32 = arith.constant 0 : i32
    %c0_i32_0 = arith.constant 0 : i32
    return %arg0, %c0_i32 : i32, i32
  }
  func.func @transform_1(%arg0: i32) -> (i32, i32) {
    %c0_i32 = arith.constant 0 : i32
    %c0_i32_0 = arith.constant 0 : i32
    %c0_i32_1 = arith.constant 0 : i32
    return %c0_i32, %c0_i32_0 : i32, i32
  }
  func.func @transform_2(%arg0: i32) -> (i32, i32) {
    %c0_i32 = arith.constant 0 : i32
    %c0_i32_0 = arith.constant 0 : i32
    %c0_i32_1 = arith.constant 0 : i32
    return %c0_i32, %c0_i32_0 : i32, i32
  }
  func.func @transform_3(%arg0: i32) -> (i32, i32) {
    %c0_i32 = arith.constant 0 : i32
    %c0_i32_0 = arith.constant 0 : i32
    return %arg0, %c0_i32 : i32, i32
  }
}

</mosaic_0001>

<bundles_post_ra>
// kernel: tpu_custom_call.1
= control target key start
LH: loop header
LB: loop body
LE: loop exit
PB: predicated region body
PF: predicated region fallthrough
CT: control target
= control target key end

     0   :  { %8 = vsyncpa [#allocation3], 0  ;;  %s374_s0 = inlined_call_operand.hbm [shape: f32[2,128], index: 0, kind: input, shape index: {}]   ;;  %s375_s1 = inlined_call_operand.hbm [shape: f32[128,256], index: 1, kind: input, shape index: {}]   ;;  %s376_s2 = inlined_call_operand.vmem [shape: f32[1,256], index: 2, kind: input, shape index: {}]   ;;  %s377_s3 = inlined_call_operand.hbm [shape: f32[2,256], index: 3, kind: output, shape index: {}]  }
   0x1   :  { %9 = vsyncpa [#allocation6], 0 }
   0x2   :  { %10 = vsyncpa [#allocation4], 0  ;;  %s302_s12 = smov [#allocation2]   ;;  %s303_s14 = smov [#allocation5]  }
   0x3   :  { %s17_s13 = sshll.u32 %s302_s12, 4  ;;  %s26_s15 = sshll.u32 %s303_s14, 4  ;;  %s18_s13 = int_to_ptr.vmem [resolvable:$true] %s17_s13  ;;  %s328_s15 = int_to_ptr.vmem [resolvable:$true] %s26_s15 }
   0x4   :  { %s230_s18 = scalar_lea.hbm %s374_s0, 32 }
   0x5   :  { %p231_p0 = scmp.ne.s32.totalorder %s374_s0, %s230_s18  ;;  %p234_p1 = scmp.lt.u32.totalorder %s230_s18, %s374_s0 }
   0x7   :  { %p236_p2 = pnand %p234_p1, %p231_p0 }
   0x9   :  { %239 = shalt.err (!%p236_p2)
}
   0xa   :  { %s240_s23 = scalar_lea.vmem %s18_s13, 32  ;;  %p245_p4 = scmp.lt.s32.totalorder %s18_s13, %s18_s13 }
   0xb   :  { %p241_p3 = scmp.ne.s32.totalorder %s18_s13, %s240_s23  ;;  %p246_p5 = scmp.lt.s32.totalorder %s240_s23, %s240_s23 }
   0xd   :  { %p247_p6 = por %p246_p5, %p245_p4 }
   0xf   :  { %p248_p7 = pnand %p247_p6, %p241_p3 }
  0x11   :  { %251 = shalt.err (!%p248_p7)
}
  0x12   :  { %20 = dma.hbm_to_vmem [thread:$0]  %s374_s0, 32, %s18_s13, [#allocation3]  }
  0x13   :  { %s252_s28 = scalar_lea.hbm %s375_s1, 4096 }
  0x14   :  { %p253_p8 = scmp.ne.s32.totalorder %s375_s1, %s252_s28  ;;  %p256_p9 = scmp.lt.u32.totalorder %s252_s28, %s375_s1 }
  0x16   :  { %p258_p10 = pnand %p256_p9, %p253_p8 }
  0x18   :  { %261 = shalt.err (!%p258_p10)
}
  0x19   :  { %s262_s6 = scalar_lea.vmem %s328_s15, 4096  ;;  %p267_p12 = scmp.lt.s32.totalorder %s328_s15, %s328_s15 }
  0x1a   :  { %p263_p11 = scmp.ne.s32.totalorder %s328_s15, %s262_s6  ;;  %p268_p13 = scmp.lt.s32.totalorder %s262_s6, %s262_s6 }
  0x1c   :  { %p269_p0 = por %p268_p13, %p267_p12 }
  0x1e   :  { %p270_p1 = pnand %p269_p0, %p263_p11 }
  0x20   :  { %273 = shalt.err (!%p270_p1)
}
  0x21   :  { %s304_s0 = smov 256   ;;  %s305_s7 = smov 16  }
  0x22   :  { %32 = dma.hbm_to_vmem [thread:$0]  %s375_s1, 4096, %s328_s15, [#allocation6], %s304_s0, %s304_s0, %s305_s7  }
  0x23   :  { %296 = dma.done.wait [#allocation3], 32  }
  0x24   :  { %297 = vsyncadd [#allocation3], 4294967264 }
  0x25   :  { %298 = dma.done.wait [#allocation6], 4096  }
  0x26   :  { %299 = vsyncadd [#allocation6], 4294963200  ;;  %v306_v0 = vmov 0.0   ;;  %v43_v1 = vld [vmem:[#allocation5 + $0x8] sm:$0xff]  ;;  %v45_v2 = vld [vmem:[#allocation5 + $0x18] sm:$0xff]  ;;  %v76_v50 = vlaneseq  ;;  %s307_s11 = smov [#allocation7]  }
  0x27   :  { %150 = vmatprep.mubr.f32.mxu0 %v306_v0  ;;  %v42_v3 = vld [vmem:[#allocation5] sm:$0xff]  ;;  %v192_v4 = vpack.c.bf16 %v45_v2, %v43_v1  ;;  %v44_v5 = vld [vmem:[#allocation5 + $0x10] sm:$0xff]  ;;  %v47_v6 = vld [vmem:[#allocation5 + $0x28] sm:$0xff]  ;;  %s181_s12 = sshll.u32 %s307_s11, 4  ;;  %s182_s12 = int_to_ptr.vmem [resolvable:$true] %s181_s12 }
  0x28   :  { %v49_v7 = vld [vmem:[#allocation5 + $0x38] sm:$0xff]  ;;  %v194_v8 = vpack.c.bf16 %v44_v5, %v42_v3  ;;  %v46_v10 = vld [vmem:[#allocation5 + $0x20] sm:$0xff]  ;;  %v48_v11 = vld [vmem:[#allocation5 + $0x30] sm:$0xff]  ;;  %v77_v51 = vshrl.u32 %v76_v50, 7  ;;  %s274_s13 = scalar_lea.vmem %s182_s12, 64  ;;  %p279_p3 = scmp.lt.s32.totalorder %s182_s12, %s182_s12 }
  0x29   :  { %v196_v9 = vpack.c.bf16 %v49_v7, %v47_v6  ;;  %v51_v12 = vld [vmem:[#allocation5 + $0x48] sm:$0xff]  ;;  %193 = vmatprep.subr.bf16.mxu0 %v192_v4  ;;  %v53_v13 = vld [vmem:[#allocation5 + $0x58] sm:$0xff]  ;;  %v198_v14 = vpack.c.bf16 %v48_v11, %v46_v10  ;;  %v50_v16 = vld [vmem:[#allocation5 + $0x40] sm:$0xff]  ;;  %p275_p2 = scmp.ne.s32.totalorder %s182_s12, %s274_s13  ;;  %p280_p4 = scmp.lt.s32.totalorder %s274_s13, %s274_s13 }
  0x2a   :  { %195 = vmatpush1.bf16.msra.mxu0 %v194_v8  ;;  %v200_v15 = vpack.c.bf16 %v53_v13, %v51_v12  ;;  %v52_v17 = vld [vmem:[#allocation5 + $0x50] sm:$0xff]  ;;  %v55_v18 = vld [vmem:[#allocation5 + $0x68] sm:$0xff]  ;;  %v57_v19 = vld [vmem:[#allocation5 + $0x78] sm:$0xff]  ;;  %v78_v52 = vsub.s32 0, %v77_v51  ;;  %v82_v54 = vsub.s32 1, %v77_v51 }
  0x2b   :  { %197 = vmatprep.subr.bf16.mxu0 %v196_v9  ;;  %v202_v20 = vpack.c.bf16 %v52_v17, %v50_v16  ;;  %v204_v21 = vpack.c.bf16 %v57_v19, %v55_v18  ;;  %v54_v22 = vld [vmem:[#allocation5 + $0x60] sm:$0xff]  ;;  %v56_v23 = vld [vmem:[#allocation5 + $0x70] sm:$0xff]  ;;  %v59_v24 = vld [vmem:[#allocation5 + $0x88] sm:$0xff]  ;;  %p281_p5 = por %p280_p4, %p279_p3 }
  0x2c   :  { %v61_v25 = vld [vmem:[#allocation5 + $0x98] sm:$0xff]  ;;  %v206_v26 = vpack.c.bf16 %v56_v23, %v54_v22  ;;  %v58_v28 = vld [vmem:[#allocation5 + $0x80] sm:$0xff]  ;;  %v60_v29 = vld [vmem:[#allocation5 + $0x90] sm:$0xff] }
  0x2d   :  { %v208_v27 = vpack.c.bf16 %v61_v25, %v59_v24  ;;  %v63_v30 = vld [vmem:[#allocation5 + $0xa8] sm:$0xff]  ;;  %v65_v31 = vld [vmem:[#allocation5 + $0xb8] sm:$0xff]  ;;  %v210_v32 = vpack.c.bf16 %v60_v29, %v58_v28  ;;  %v62_v34 = vld [vmem:[#allocation5 + $0xa0] sm:$0xff]  ;;  %p282_p6 = pnand %p281_p5, %p275_p2 }
  0x2e   :  { %199 = vmatpush1.bf16.msra.mxu0 %v198_v14  ;;  %v212_v33 = vpack.c.bf16 %v65_v31, %v63_v30  ;;  %v64_v35 = vld [vmem:[#allocation5 + $0xb0] sm:$0xff]  ;;  %v67_v36 = vld [vmem:[#allocation5 + $0xc8] sm:$0xff]  ;;  %v69_v37 = vld [vmem:[#allocation5 + $0xd8] sm:$0xff] }
  0x2f   :  { %201 = vmatprep.subr.bf16.mxu0 %v200_v15  ;;  %v214_v38 = vpack.c.bf16 %v64_v35, %v62_v34  ;;  %v216_v39 = vpack.c.bf16 %v69_v37, %v67_v36  ;;  %v66_v40 = vld [vmem:[#allocation5 + $0xc0] sm:$0xff]  ;;  %v68_v41 = vld [vmem:[#allocation5 + $0xd0] sm:$0xff]  ;;  %v71_v42 = vld [vmem:[#allocation5 + $0xe8] sm:$0xff] }
  0x30   :  { %v73_v43 = vld [vmem:[#allocation5 + $0xf8] sm:$0xff]  ;;  %v218_v44 = vpack.c.bf16 %v68_v41, %v66_v40  ;;  %v70_v46 = vld [vmem:[#allocation5 + $0xe0] sm:$0xff]  ;;  %v72_v47 = vld [vmem:[#allocation5 + $0xf0] sm:$0xff] }
  0x31   :  { %v220_v45 = vpack.c.bf16 %v73_v43, %v71_v42  ;;  %v222_v48 = vpack.c.bf16 %v72_v47, %v70_v46  ;;  %v41_v49 = vld [vmem:[#allocation2] sm:$0x3] }
  0x32   :  { %203 = vmatpush1.bf16.msra.mxu0 %v202_v20  ;;  %v74_v53 = vld [vmem:[%s376_s2] sm:$0x3] }
  0x33   :  { %205 = vmatprep.subr.bf16.mxu0 %v204_v21  ;;  %v79_v55 = vrot.slane %v74_v53, %v78_v52  ;;  %v83_v56 = vrot.slane %v74_v53, %v82_v54 }
  0x36   :  { %207 = vmatpush1.bf16.msra.mxu0 %v206_v26 }
  0x37   :  { %209 = vmatprep.subr.bf16.mxu0 %v208_v27 }
  0x3a   :  { %211 = vmatpush1.bf16.msra.mxu0 %v210_v32 }
  0x3b   :  { %213 = vmatprep.subr.bf16.mxu0 %v212_v33 }
  0x3e   :  { %215 = vmatpush1.bf16.msra.mxu0 %v214_v38 }
  0x3f   :  { %217 = vmatprep.subr.bf16.mxu0 %v216_v39 }
  0x42   :  { %219 = vmatpush1.bf16.msra.mxu0 %v218_v44 }
  0x43   :  { %221 = vmatprep.subr.bf16.mxu0 %v220_v45 }
  0x46   :  { %223 = vmatpush1.bf16.msra.mxu0 %v222_v48 }
  0x49   :  { %151 = vmatmul.mubr.f32.vlgmr.msra.gmra.mrb[0].mxu0 %v41_v49 }
 0x11c   :  { %v152_v57 = vpop.f32.mrb[0].mxu0 }
 0x11d   :  { %v153_v58 = vadd.f32 %v152_v57, %v79_v55  ;;  %v154_v59 = vpop.f32.mrb[1].mxu0 }
 0x11e   :  { %v155_v60 = vadd.f32 %v154_v59, %v83_v56 }
 0x11f   :  { %vm157_vm0 = vcmp.gt.f32.partialorder %v153_v58, 0.0  ;;  %v159_v61 = vmul.f32 0.01, %v153_v58 }
 0x120   :  { %vm158_vm1 = vcmp.gt.f32.partialorder %v155_v60, 0.0  ;;  %v160_v62 = vmul.f32 0.01, %v155_v60 }
 0x121   :  { %v161_v63 = vsel %vm157_vm0, %v153_v58, %v159_v61 }
 0x122   :  { %v162_v0 = vsel %vm158_vm1, %v155_v60, %v160_v62 }
 0x123   :  { %v165_v1 = vcombine.low %v161_v63, %v162_v0 }
 0x125   :  { %191 = vst.sshfl [vmem:[#allocation7] sm:$0x33 pattern:$0x76325410] %v165_v1 }
 0x126   :  { %285 = shalt.err (!%p282_p6)
}
 0x127   :  { %s286_s15 = scalar_lea.hbm %s377_s3, 64 }
 0x128   :  { %p287_p7 = scmp.ne.s32.totalorder %s377_s3, %s286_s15  ;;  %p290_p8 = scmp.lt.u32.totalorder %s286_s15, %s377_s3 }
 0x12a   :  { %p292_p9 = pnand %p290_p8, %p287_p7 }
 0x12c   :  { %295 = shalt.err (!%p292_p9)
}
 0x12d   :  { %184 = dma.vmem_to_hbm [thread:$0]  %s182_s12, 64, %s377_s3, [#allocation4]  }
 0x12e   :  { %300 = dma.done.wait [#allocation4], 64  }
 0x12f   :  { %301 = vsyncadd [#allocation4], 4294967232 }
 0x130   :  { %188 = vsyncpa [#allocation3], 1 }
 0x131   :  { %189 = vsyncpa [#allocation6], 1 }
 0x132   :  { %190 = vsyncpa [#allocation4], 1 }

</bundles_post_ra>
